<compile_context>
chip_gen: v5e
topology: v5e:2x2
jax: 0.10.0
libtpu: 0.0.40
codegen_flags: <defaults>
</compile_context>

<pallas_src>
import functools

import jax
import jax.numpy as jnp
from jax.experimental import pallas as pl
from jax.experimental.pallas import tpu as pltpu


def _protbert_mlp_kernel(x_ref, w1_ref, b1_ref, w2r_ref, b2_ref, o_ref,
                         acc_ref, *, inv_len):
    l = pl.program_id(1)

    @pl.when(l == 0)
    def _init():
        acc_ref[...] = jnp.zeros_like(acc_ref)

    # Chunkwise residue-sum: (Bt, Lt, D) bf16 chunk -> f32 accumulator.
    acc_ref[...] += jnp.sum(x_ref[...].astype(jnp.float32), axis=1)

    @pl.when(l == pl.num_programs(1) - 1)
    def _finalize():
        # 'mean' readout: fold the 1/L scale into one multiply.
        feat = acc_ref[...] * inv_len                                  # (Bt, D)
        # Layer 1: Linear(D -> H) + relu (dropout == identity at inference).
        h = jnp.dot(feat, w1_ref[...],
                    preferred_element_type=jnp.float32) + b1_ref[...]  # (Bt, H)
        h = jnp.maximum(h, 0.0)
        # Layer 2: Linear(H -> 1) as VPU mul + lane reduction (N=1 matmul
        # would use <1% of the MXU and still pay a full push/pop).
        y = jnp.sum(h * w2r_ref[...], axis=-1, keepdims=True) + b2_ref[0, 0]
        o_ref[...] = y.astype(o_ref.dtype)


def protbert_mlp_forward(x, w1, b1, w2, b2, *, bt=None, lt=None,
                         vmem_limit_bytes=32 * 1024 * 1024):
    B, L, D = x.shape
    H = w1.shape[1]
    O = w2.shape[1]
    assert w1.shape == (D, H) and b1.shape == (1, H)
    assert w2.shape == (H, O) and b2.shape == (1, O) and O == 1

    # ---- tile selection -------------------------------------------------
    # Batch tile: multiple of 8 (sublane) unless it covers the full batch.
    if bt is None:
        bt = B if (B <= 8 or B % 8 != 0) else 8
    assert B % bt == 0

    # Residue-chunk tile: multiple of 8, sized so the double-buffered x
    # stream (2 * bt*lt*D*itemsize) stays within ~1/4 of the VMEM budget —
    # this also respects v7x's smaller 64 MiB VMEM and the 16/32 MiB scoped
    # defaults on v5e/v6e, leaving room for the resident weights + scratch.
    itemsize = jnp.dtype(x.dtype).itemsize
    if lt is None:
        cap = max(8, (vmem_limit_bytes // 4) // (2 * bt * D * itemsize))
        if L <= 8 or L % 8 != 0:
            lt = L
        else:
            lt = min(L, (cap // 8) * 8)
            while lt > 8 and L % lt != 0:
                lt -= 8
            if L % lt != 0:
                lt = L
    assert L % lt == 0
    assert lt == L or lt % 8 == 0

    grid = (B // bt, L // lt)

    # Layer-2 weight as a (1, H) row so the kernel can do a lane reduction.
    w2_row = w2.T.astype(jnp.float32)            # (1, H)
    b2_s = b2.astype(jnp.float32)                # (1, 1) scalar, goes to SMEM

    kernel = functools.partial(_protbert_mlp_kernel, inv_len=1.0 / L)

    flops = 2 * B * D * H + 2 * B * H
    bytes_accessed = (B * L * D * itemsize      # streamed activations
                      + D * H * 4 + H * 4       # resident w1 / b1
                      + H * 4 + 4               # w2 row / b2
                      + B * O * 4)              # output

    out = pl.pallas_call(
        kernel,
        out_shape=jax.ShapeDtypeStruct((B, O), jnp.float32),
        grid_spec=pltpu.PrefetchScalarGridSpec(
            num_scalar_prefetch=0,
            grid=grid,
            in_specs=[
                # x: streamed chunks, auto double-buffered over the L axis.
                pl.BlockSpec((bt, lt, D), lambda b, l: (b, l, 0)),
                # weights / biases: constant index_maps -> VMEM-resident
                # across the whole reduction (no per-step re-DMA).
                pl.BlockSpec((D, H), lambda b, l: (0, 0)),
                pl.BlockSpec((1, H), lambda b, l: (0, 0)),
                pl.BlockSpec((1, H), lambda b, l: (0, 0)),
                # (1,1) scalar bias in SMEM (avoids an (8,128) VMEM tile).
                pl.BlockSpec(memory_space=pltpu.MemorySpace.SMEM),
            ],
            # Same output block across the L axis -> resident until final write.
            out_specs=pl.BlockSpec((bt, O), lambda b, l: (b, 0)),
            scratch_shapes=[pltpu.VMEM((bt, D), jnp.float32)],
        ),
        compiler_params=pltpu.CompilerParams(
            dimension_semantics=("parallel", "arbitrary"),
            vmem_limit_bytes=vmem_limit_bytes,
        ),
        cost_estimate=pl.CostEstimate(
            flops=flops, transcendentals=0, bytes_accessed=bytes_accessed),
    )(x, w1, b1, w2_row, b2_s)
    return out


def init_linear(key, fan_in, fan_out):
    # Mimic torch.nn.Linear default init: U(-1/sqrt(fan_in), 1/sqrt(fan_in))
    kw, kb = jax.random.split(key)
    bound = 1.0 / jnp.sqrt(jnp.float32(fan_in))
    w = jax.random.uniform(kw, (fan_in, fan_out), jnp.float32, -bound, bound)
    b = jax.random.uniform(kb, (1, fan_out), jnp.float32, -bound, bound)
    return w, b


if __name__ == "__main__":
    # Small stand-in shapes (real ProtBert/ESM output_dim is 1024/1280).
    B, L, D = 16, 32, 128    # graphs, residues per graph, embed dim
    H, O = D, 1              # mlp_hid_channels=-1 -> hid == in ; out_channels=1

    key = jax.random.PRNGKey(0)
    k_x, k_l1, k_l2 = jax.random.split(key, 3)

    # Synthetic per-residue encoder embeddings, streamed as bf16 (halves HBM
    # traffic for this bandwidth-bound kernel); all math accumulates in f32.
    x = jax.random.normal(k_x, (B, L, D), dtype=jnp.float32).astype(jnp.bfloat16)

    w1, b1 = init_linear(k_l1, D, H)
    w2, b2 = init_linear(k_l2, H, O)

    # bt=8, lt=16 -> grid (2, 2): exercises both the batch tiling and the
    # chunked L reduction on these small shapes.
    out = protbert_mlp_forward(x, w1, b1, w2, b2, bt=8, lt=16)
    out = jax.block_until_ready(out)

    # Pure-JAX reference (same bf16 input values, f32 math).
    xf = x.astype(jnp.float32)
    feat = jnp.mean(xf, axis=1)
    ref = jnp.maximum(feat @ w1 + b1, 0.0) @ w2 + b2
    assert out.shape == (B, O)
    assert jnp.allclose(out, ref, atol=1e-3, rtol=1e-3)

    print("KERNEL_OK")
</pallas_src>

<mosaic_0001>
module attributes {stable_mosaic.version = 11 : i64} {
  func.func @_protbert_mlp_kernel(%arg0: i32, %arg1: i32, %arg2: memref<8x16x128xbf16, #tpu.memory_space<vmem>>, %arg3: memref<128x128xf32, #tpu.memory_space<vmem>>, %arg4: memref<1x128xf32, #tpu.memory_space<vmem>>, %arg5: memref<1x128xf32, #tpu.memory_space<vmem>>, %arg6: memref<1x1xf32, #tpu.memory_space<smem>>, %arg7: memref<8x1xf32, #tpu.memory_space<vmem>>, %arg8: memref<8x128xf32, #tpu.memory_space<vmem>>) attributes {dimension_semantics = [#tpu.dimension_semantics<parallel>, #tpu.dimension_semantics<arbitrary>], iteration_bounds = array<i64: 2, 2>, scalar_prefetch = 0 : i64, scratch_operands = 1 : i64, tpu.core_type = #tpu.core_type<tc>, window_params = [{transform_indices = @transform_0, window_bounds = array<i64: 8, 16, 128>}, {pipeline_mode = #tpu.pipeline_mode<synchronous>, transform_indices = @transform_1, window_bounds = array<i64: 128, 128>}, {pipeline_mode = #tpu.pipeline_mode<synchronous>, transform_indices = @transform_2, window_bounds = array<i64: 1, 128>}, {pipeline_mode = #tpu.pipeline_mode<synchronous>, transform_indices = @transform_3, window_bounds = array<i64: 1, 128>}, {transform_indices = @transform_4, window_bounds = array<i64: 1, 1>}, {transform_indices = @transform_5, window_bounds = array<i64: 8, 1>}]} {
    %c0_i32 = arith.constant 0 : i32
    %0 = arith.cmpi eq, %arg1, %c0_i32 : i32
    %1 = arith.extui %0 : i1 to i32
    %c0_i32_0 = arith.constant 0 : i32
    %2 = arith.cmpi ne, %1, %c0_i32_0 : i32
    scf.if %2 {
      %cst_8 = arith.constant 0.000000e+00 : f32
      %12 = vector.broadcast %cst_8 : f32 to vector<8x128xf32>
      %c0_9 = arith.constant 0 : index
      %c0_10 = arith.constant 0 : index
      %13 = vector.load %arg8[%c0_9, %c0_10] : memref<8x128xf32, #tpu.memory_space<vmem>>, vector<8x128xf32>
      tpu.vector_store %arg8[%c0_9, %c0_10], %12 {strides = array<i32>} : memref<8x128xf32, #tpu.memory_space<vmem>>, vector<8x128xf32>,
    } else {
    }
    %c0 = arith.constant 0 : index
    %c0_1 = arith.constant 0 : index
    %3 = vector.load %arg8[%c0, %c0_1] : memref<8x128xf32, #tpu.memory_space<vmem>>, vector<8x128xf32>
    %c0_2 = arith.constant 0 : index
    %c0_3 = arith.constant 0 : index
    %c0_4 = arith.constant 0 : index
    %4 = vector.load %arg2[%c0_2, %c0_3, %c0_4] : memref<8x16x128xbf16, #tpu.memory_space<vmem>>, vector<8x16x128xbf16>
    %5 = arith.extf %4 : vector<8x16x128xbf16> to vector<8x16x128xf32>
    %cst = arith.constant dense<0.000000e+00> : vector<8x128xf32>
    %6 = vector.multi_reduction <add>, %5, %cst [1] : vector<8x16x128xf32> to vector<8x128xf32>
    %7 = arith.addf %3, %6 : vector<8x128xf32>
    %c0_5 = arith.constant 0 : index
    %c0_6 = arith.constant 0 : index
    %8 = vector.load %arg8[%c0_5, %c0_6] : memref<8x128xf32, #tpu.memory_space<vmem>>, vector<8x128xf32>
    tpu.vector_store %arg8[%c0_5, %c0_6], %7 {strides = array<i32>} : memref<8x128xf32, #tpu.memory_space<vmem>>, vector<8x128xf32>,
    %c1_i32 = arith.constant 1 : i32
    %9 = arith.cmpi eq, %arg1, %c1_i32 : i32
    %10 = arith.extui %9 : i1 to i32
    %c0_i32_7 = arith.constant 0 : i32
    %11 = arith.cmpi ne, %10, %c0_i32_7 : i32
    scf.if %11 {
      %c0_8 = arith.constant 0 : index
      %c0_9 = arith.constant 0 : index
      %12 = vector.load %arg8[%c0_8, %c0_9] : memref<8x128xf32, #tpu.memory_space<vmem>>, vector<8x128xf32>
      %cst_10 = arith.constant 3.125000e-02 : f32
      %13 = vector.broadcast %cst_10 : f32 to vector<8x128xf32>
      %14 = arith.mulf %12, %13 : vector<8x128xf32>
      %c0_11 = arith.constant 0 : index
      %c0_12 = arith.constant 0 : index
      %15 = vector.load %arg3[%c0_11, %c0_12] : memref<128x128xf32, #tpu.memory_space<vmem>>, vector<128x128xf32>
      %cst_13 = arith.constant dense<0.000000e+00> : vector<8x128xf32>
      %16 = tpu.matmul %14, %15, %cst_13 {dimension_numbers = #tpu.dot_dimension_numbers<[1], [0], [0], [1], [0, 0, 1, 1], [], []>} : vector<8x128xf32>, vector<128x128xf32>, vector<8x128xf32> -> vector<8x128xf32>
      %c0_14 = arith.constant 0 : index
      %c0_15 = arith.constant 0 : index
      %17 = vector.load %arg4[%c0_14, %c0_15] : memref<1x128xf32, #tpu.memory_space<vmem>>, vector<1x128xf32>
      %18 = vector.broadcast %17 : vector<1x128xf32> to vector<8x128xf32>
      %19 = arith.addf %16, %18 : vector<8x128xf32>
      %cst_16 = arith.constant 0.000000e+00 : f32
      %20 = vector.broadcast %cst_16 : f32 to vector<8x128xf32>
      %21 = arith.maximumf %19, %20 : vector<8x128xf32>
      %c0_17 = arith.constant 0 : index
      %c0_18 = arith.constant 0 : index
      %22 = vector.load %arg5[%c0_17, %c0_18] : memref<1x128xf32, #tpu.memory_space<vmem>>, vector<1x128xf32>
      %23 = vector.broadcast %22 : vector<1x128xf32> to vector<8x128xf32>
      %24 = arith.mulf %21, %23 : vector<8x128xf32>
      %cst_19 = arith.constant dense<0.000000e+00> : vector<8xf32>
      %25 = vector.multi_reduction <add>, %24, %cst_19 [1] : vector<8x128xf32> to vector<8xf32>
      %26 = vector.shape_cast %25 : vector<8xf32> to vector<8x1xf32>
      %c0_20 = arith.constant 0 : index
      %c0_21 = arith.constant 0 : index
      %27 = memref.load %arg6[%c0_20, %c0_21] : memref<1x1xf32, #tpu.memory_space<smem>>
      %28 = vector.broadcast %27 : f32 to vector<8x1xf32>
      %29 = arith.addf %26, %28 : vector<8x1xf32>
      %c0_22 = arith.constant 0 : index
      %c0_23 = arith.constant 0 : index
      %30 = vector.load %arg7[%c0_22, %c0_23] : memref<8x1xf32, #tpu.memory_space<vmem>>, vector<8x1xf32>
      tpu.vector_store %arg7[%c0_22, %c0_23], %29 {strides = array<i32>} : memref<8x1xf32, #tpu.memory_space<vmem>>, vector<8x1xf32>,
    } else {
    }
    return
  }
  func.func @transform_0(%arg0: i32, %arg1: i32) -> (i32, i32, i32) {
    %c0_i32 = arith.constant 0 : i32
    %c0_i32_0 = arith.constant 0 : i32
    return %arg0, %arg1, %c0_i32 : i32, i32, i32
  }
  func.func @transform_1(%arg0: i32, %arg1: i32) -> (i32, i32) {
    %c0_i32 = arith.constant 0 : i32
    %c0_i32_0 = arith.constant 0 : i32
    %c0_i32_1 = arith.constant 0 : i32
    return %c0_i32, %c0_i32_0 : i32, i32
  }
  func.func @transform_2(%arg0: i32, %arg1: i32) -> (i32, i32) {
    %c0_i32 = arith.constant 0 : i32
    %c0_i32_0 = arith.constant 0 : i32
    %c0_i32_1 = arith.constant 0 : i32
    return %c0_i32, %c0_i32_0 : i32, i32
  }
  func.func @transform_3(%arg0: i32, %arg1: i32) -> (i32, i32) {
    %c0_i32 = arith.constant 0 : i32
    %c0_i32_0 = arith.constant 0 : i32
    %c0_i32_1 = arith.constant 0 : i32
    return %c0_i32, %c0_i32_0 : i32, i32
  }
  func.func @transform_4(%arg0: i32, %arg1: i32) -> (i32, i32) {
    %c0_i32 = arith.constant 0 : i32
    %c0_i32_0 = arith.constant 0 : i32
    %c0_i32_1 = arith.constant 0 : i32
    return %c0_i32, %c0_i32_0 : i32, i32
  }
  func.func @transform_5(%arg0: i32, %arg1: i32) -> (i32, i32) {
    %c0_i32 = arith.constant 0 : i32
    %c0_i32_0 = arith.constant 0 : i32
    return %arg0, %c0_i32 : i32, i32
  }
}

</mosaic_0001>

<bundles_post_ra>
// kernel: tpu_custom_call.1
= control target key start
LH: loop header
LB: loop body
LE: loop exit
PB: predicated region body
PF: predicated region fallthrough
CT: control target
= control target key end

     0   :  { %s1035_s0 = inlined_call_operand.hbm [shape: bf16[16,32,128], index: 0, kind: input, shape index: {}]   ;;  %s1036_s1 = inlined_call_operand.hbm [shape: f32[128,128], index: 1, kind: input, shape index: {}]   ;;  %s1037_s2 = inlined_call_operand.vmem [shape: f32[1,128], index: 2, kind: input, shape index: {}]   ;;  %s1038_s3 = inlined_call_operand.vmem [shape: f32[1,128], index: 3, kind: input, shape index: {}]   ;;  %s1039_s4 = inlined_call_operand.<no memory space> [shape: f32[1,1], index: 4, kind: input, shape index: {}]   ;;  %s1040_s5 = inlined_call_operand.vmem [shape: f32[16,1], index: 5, kind: output, shape index: {}]  }
   0x1   :  { %1043 = sst [smem:[#allocation15_spill]] %s1036_s1 }
   0x2   :  { %10 = sst [smem:[#allocation3]] %s1039_s4 }
   0x3   :  { %11 = vsyncpa [#allocation5], 0 }
   0x4   :  { %13 = vsyncpa [#allocation5 + $0x1], 0 }
   0x5   :  { %14 = vsyncpa [#allocation7], 0  ;;  %s874_s20 = smov 0   ;;  %s876_s21 = smov 0  }
   0x6   :  { %s878_s22 = smov 0   ;;  %s880_s23 = smov 0  }
   0x7   :  { %s882_s24 = smov 0   ;;  %s884_s25 = smov 0  }
   0x8   :  { %s886_s26 = smov 0   ;;  %s888_s27 = smov 0  }
   0x9 LB: > { %s574_s4 = sadd.s32 4294967295, %s829_s27   ;;  %s29_s28 = sadd.s32 1, %s821_s25  ;;  %s829_s27 = sphi %s888_s27, %s20_s27   ;;  %s825_s26 = sphi %s886_s26, %s1059_s26   ;;  %s821_s25 = sphi %s884_s25, %s1058_s25   ;;  %s817_s24 = sphi %s882_s24, %s1057_s24   ;;  %s813_s23 = sphi %s880_s23, %s1056_s23   ;;  %s809_s22 = sphi %s878_s22, %s1055_s22   ;;  %s805_s21 = sphi %s876_s21, %s1054_s21   ;;  %s801_s20 = sphi %s874_s20, %s1053_s20  }
   0xa   : > { %p30_p0 = scmp.ge.s32.totalorder %s29_s28, 2  ;;  %s32_s29 = sadd.s32 1, %s825_s26 }
   0xb   : > { %s41_s30 = sadd.s32 1, %s809_s22  ;;  %p48_p1 = scmp.ne.s32.totalorder %s809_s22, %s805_s21 }
   0xc   : > { %s1061_s28 = smov (%p30_p0, %s29_s28), 0  ;;  %s1063_s29 = smov (!%p30_p0, %s32_s29), %s825_s26 }
   0xd   : > { %1044 = sst [smem:[#allocation13_spill]] %s1061_s28  ;;  %s37_s6 = ssub.s32 %s821_s25, %s1061_s28 }
   0xe   : > { %p49_p2 = scmp.eq.s32.totalorder %s829_s27, 0  ;;  %p34_p3 = scmp.ge.s32.totalorder %s1063_s29, 2 }
   0xf   : > { %p54_p4 = scmp.ne.s32.totalorder %s805_s21, %s801_s20  ;;  %p929_p6 = scmp.eq.s32.totalorder %s574_s4, 0 }
  0x10   : > { %p925_p5 = por %p49_p2, %p48_p1  ;;  %s1065_s29 = smov (%p34_p3, %s1063_s29), 0 }
  0x11   : > { %1047 = sst [smem:[#allocation14_spill]] %s1065_s29  ;;  %p937_p7 = por %p929_p6, %p54_p4 }
  0x12   : > { %p576_p8 = scmp.ge.s32.totalorder %s829_s27, 1  ;;  %s36_s10 = ssub.s32 %s825_s26, %s1065_s29 }
  0x13   : > { %p175_p9 = scmp.lt.s32.totalorder %s829_s27, 5  ;;  %s38_s11 = sor.u32 %s37_s6, %s36_s10 }
  0x14   : > { %p39_p10 = scmp.eq.s32.totalorder %s38_s11, 0  ;;  %s1050_s1 = sld [smem:[#allocation15_spill]] }
  0x15   : > { %p945_p11 = pnand %p576_p8, %p175_p9  ;;  %s831_s17 = smov [#allocation6]  }
  0x16   : > { %s953_s16 = scalar_select %p39_p10, %s809_s22, %s41_s30  }
  0x17   : > { %p647_p12 = pneg %p945_p11  ;;  %s188_s18 = sshll.u32 %s831_s17, 4  ;;  %s189_s18 = int_to_ptr.vmem [resolvable:$true] %s188_s18 }
  0x18   : > { %s832_s19 = smov 128   ;;  %s833_s20 = smov 8  }
  0x19   : > { %p648_p13 = pnand %p647_p12, %p929_p6  ;;  %p578_p0 = scmp.ge.s32.totalorder %s829_s27, 4 }
  0x1a   : > { %s186_s15 = sshll.u32 %s1050_s1, 4  ;;  %s187_s15 = int_to_ptr.hbm [resolvable:$true] %s186_s15 }
  0x1b   : > { %650 = dma.hbm_to_vmem [thread:$0]  (!%p648_p13), %s187_s15, 2048, %s189_s18, [#allocation7], %s832_s19, %s832_s19, %s833_s20  }
  0x1c   : > { %207 = sbr.rel (%p578_p0) target bundleno = 49 (0x31), region = 32 }
  0x21   : > { %s211_s4 = sand.u32 1, %s809_s22   ;;  %s581_s30 = sshll.u32 %s821_s25, 1 }
  0x22   : > { %s579_s6 = sshll.u32 %s211_s4, 6  ;;  %s594_s10 = sshll.u32 %s825_s26, 5 }
  0x23   : > { %s221_s11 = sadd.s32 %s594_s10, %s581_s30  ;;  %s215_s14 = scalar_lea.vmem [#allocation4], %s579_s6 }
  0x24   : > { %s583_s13 = sshll.u32 %s221_s11, 2  ;;  %s238_s15 = sshll.u32 %s215_s14, 4  ;;  %s239_s15 = int_to_ptr.vmem [resolvable:$true] %s238_s15 }
  0x25   : > { %s223_s19 = scalar_lea.hbm %s1035_s0, %s583_s13  ;;  %s834_s1 = smov 256  }
  0x26   : > { %s636_s20 = scalar_select %p925_p5, [#allocation0], [#allocation10] }
  0x27   : > { %637 = sst [smem:[#allocation9]] (%p925_p5), %s834_s1  ;;  %s236_s28 = sshll.u32 %s223_s19, 4  ;;  %s237_s28 = int_to_ptr.hbm [resolvable:$true] %s236_s28 }
  0x28   : > { %s228_s29 = sld [smem:[%s636_s20]]   ;;  %s835_s30 = smov 128  }
  0x29   : > { %638 = sst [smem:[#allocation9 + $0x1]] (%p925_p5), %s835_s30  ;;  %s836_s6 = smov 2  }
  0x2a   : > { %639 = sst [smem:[#allocation9 + $0x2]] (%p925_p5), %s836_s6  ;;  %s837_s10 = smov 64  }
  0x2b   : > { %640 = sst [smem:[#allocation9 + $0x3]] (%p925_p5), %s837_s10  ;;  %s838_s13 = smov 4  }
  0x2c   : > { %641 = sst [smem:[#allocation9 + $0x4]] (%p925_p5), %s837_s10  ;;  %s212_s14 = scalar_lea.sflag [#allocation5], %s211_s4 }
  0x2d   : > { %642 = sst [smem:[#allocation9 + $0x5]] (%p925_p5), %s838_s13  ;;  %s839_s17 = smov [#allocation8]  }
  0x2e   : > { %s584_s11 = sshll.u32 %s228_s29, 26 }
  0x2f   : > { %s585_s1 = sadd.s32 134217728, %s584_s11 }
  0x30   : > { %643 = dma.general (%p925_p5), %s237_s28, 1024, %s239_s15, %s212_s14, %s839_s17, [#allocation9], %s585_s1, 0  }
  0x31 PF: > { %263 = sbr.rel (%p945_p11) target bundleno = 378 (0x17a), region = 40  ;;  %s265_s18 = sand.u32 (!%p945_p11), 1, %s805_s21  }
  0x32   : > { %s587_s19 = sshll.u32 (!%p945_p11), %s265_s18, 6  ;;  %s266_s20 = scalar_lea.sflag (!%p945_p11), [#allocation5], %s265_s18 }
  0x33   : > { %s269_s30 = scalar_lea.vmem (!%p945_p11), [#allocation4], %s587_s19 }
  0x36   : > { %792 = dma.done.wait (%p937_p7), %s266_s20, 1024  }
  0x37   : > { %794 = vsyncadd (%p937_p7), %s266_s20, 4294966272 }
  0x38   : > { %796 = dma.done.wait (%p929_p6), [#allocation7], 2048  }
  0x39   : > { %798 = vsyncadd (%p929_p6), [#allocation7], 4294965248  ;;  %p303_p1 = scmp.lt.s32.totalorder %s817_s24, 1  ;;  %p590_p2 = scmp.ne.s32.totalorder %s813_s23, 0 }
  0x3b   : > { %s1067_s24 = smov (!%p303_p1, %s817_s24), 1  ;;  %310 = sbr.rel (%p590_p2) target bundleno = 66 (0x42), region = 52 }
  0x3c   : > { %s589_s28 = sshll.u32 %s1067_s24, 3 }
  0x3d   : > { %s998_s12 = scalar_lea.vmem %s1040_s5, %s589_s28 }
  0x40   : > { %v840_v0 = vmov 0.0  }
  0x41   : > { %311 = vst [vmem:[#allocation2] sm:$0xff] %v840_v0 }
  0x42 PF: > { %v596_v1 = vld [vmem:[%s269_s30] sm:$0xff]   ;;  %v627_v2 = vld [vmem:[%s269_s30 + $0x8] sm:$0xff]   ;;  %v628_v7 = vld [vmem:[%s269_s30 + $0x10] sm:$0xff]   ;;  %vm409_vm0 = vcmask 1041409   ;;  %vm411_vm1 = vcmask 1042434   ;;  %vm413_vm2 = vcmask 1043459  }
  0x43   : > { %v597_v3 = vunpack.c.l.bf16 %v596_v1  ;;  %v598_v4 = vunpack.c.h.bf16 %v596_v1  ;;  %v601_v5 = vunpack.c.l.bf16 %v627_v2  ;;  %v602_v6 = vunpack.c.h.bf16 %v627_v2  ;;  %v629_v8 = vld [vmem:[%s269_s30 + $0x18] sm:$0xff]   ;;  %v630_v9 = vld [vmem:[%s269_s30 + $0x20] sm:$0xff]   ;;  %v631_v14 = vld [vmem:[%s269_s30 + $0x28] sm:$0xff]   ;;  %p591_p3 = scmp.ne.s32.totalorder %s813_s23, 1 }
  0x44   : > { %v605_v10 = vunpack.c.l.bf16 %v628_v7  ;;  %v606_v11 = vunpack.c.h.bf16 %v628_v7  ;;  %v609_v12 = vunpack.c.l.bf16 %v629_v8  ;;  %v610_v13 = vunpack.c.h.bf16 %v629_v8  ;;  %v632_v15 = vld [vmem:[%s269_s30 + $0x30] sm:$0xff]   ;;  %v633_v16 = vld [vmem:[%s269_s30 + $0x38] sm:$0xff]   ;;  %s480_s4 = sld [smem:[#allocation3]] (!%p591_p3) }
  0x45   : > { %v613_v17 = vunpack.c.l.bf16 %v630_v9  ;;  %v614_v18 = vunpack.c.h.bf16 %v630_v9  ;;  %v617_v19 = vunpack.c.l.bf16 %v631_v14  ;;  %v618_v20 = vunpack.c.h.bf16 %v631_v14 }
  0x46   : > { %v621_v21 = vunpack.c.l.bf16 %v632_v15  ;;  %v622_v22 = vunpack.c.h.bf16 %v632_v15  ;;  %v625_v23 = vunpack.c.l.bf16 %v633_v16  ;;  %v626_v24 = vunpack.c.h.bf16 %v633_v16 }
  0x47   : > { %v345_v25 = vadd.f32 %v598_v4, %v597_v3  ;;  %v352_v26 = vadd.f32 %v602_v6, %v601_v5  ;;  %v359_v27 = vadd.f32 %v606_v11, %v605_v10  ;;  %v366_v28 = vadd.f32 %v610_v13, %v609_v12 }
  0x48   : > { %v373_v29 = vadd.f32 %v614_v18, %v613_v17  ;;  %v380_v30 = vadd.f32 %v618_v20, %v617_v19  ;;  %v387_v31 = vadd.f32 %v622_v22, %v621_v21  ;;  %v394_v32 = vadd.f32 %v626_v24, %v625_v23  ;;  %v312_v21 = vld [vmem:[#allocation2] sm:$0xff] }
  0x49   : > { %v346_v33 = vrot.slane %v345_v25, 4  ;;  %v353_v34 = vrot.slane %v352_v26, 4  ;;  %v360_v35 = vrot.slane %v359_v27, 4  ;;  %v367_v36 = vrot.slane %v366_v28, 4 }
  0x4a   : > { %v374_v37 = vrot.slane %v373_v29, 4  ;;  %v381_v38 = vrot.slane %v380_v30, 4  ;;  %v388_v39 = vrot.slane %v387_v31, 4  ;;  %v395_v40 = vrot.slane %v394_v32, 4 }
  0x4b   : > { %v347_v41 = vadd.f32 %v346_v33, %v345_v25  ;;  %v354_v42 = vadd.f32 %v353_v34, %v352_v26  ;;  %v361_v43 = vadd.f32 %v360_v35, %v359_v27  ;;  %v368_v44 = vadd.f32 %v367_v36, %v366_v28 }
  0x4c   : > { %v375_v45 = vadd.f32 %v374_v37, %v373_v29  ;;  %v382_v46 = vadd.f32 %v381_v38, %v380_v30  ;;  %v389_v47 = vadd.f32 %v388_v39, %v387_v31  ;;  %v396_v48 = vadd.f32 %v395_v40, %v394_v32 }
  0x4d   : > { %v348_v49 = vrot.slane %v347_v41, 2  ;;  %v355_v50 = vrot.slane %v354_v42, 2  ;;  %v362_v51 = vrot.slane %v361_v43, 2  ;;  %v369_v52 = vrot.slane %v368_v44, 2 }
  0x4e   : > { %v376_v53 = vrot.slane %v375_v45, 2  ;;  %v383_v54 = vrot.slane %v382_v46, 2  ;;  %v390_v55 = vrot.slane %v389_v47, 2  ;;  %v397_v56 = vrot.slane %v396_v48, 2 }
  0x4f   : > { %v349_v57 = vadd.f32 %v348_v49, %v347_v41  ;;  %v356_v58 = vadd.f32 %v355_v50, %v354_v42  ;;  %v363_v59 = vadd.f32 %v362_v51, %v361_v43  ;;  %v370_v60 = vadd.f32 %v369_v52, %v368_v44 }
  0x50   : > { %v377_v61 = vadd.f32 %v376_v53, %v375_v45  ;;  %v384_v62 = vadd.f32 %v383_v54, %v382_v46  ;;  %v391_v63 = vadd.f32 %v390_v55, %v389_v47  ;;  %v398_v0 = vadd.f32 %v397_v56, %v396_v48 }
  0x51   : > { %v350_v1 = vrot.slane %v349_v57, 1  ;;  %v357_v2 = vrot.slane %v356_v58, 1  ;;  %v364_v3 = vrot.slane %v363_v59, 1  ;;  %v371_v4 = vrot.slane %v370_v60, 1 }
  0x52   : > { %v378_v5 = vrot.slane %v377_v61, 1  ;;  %v385_v6 = vrot.slane %v384_v62, 1  ;;  %v392_v7 = vrot.slane %v391_v63, 1  ;;  %v399_v8 = vrot.slane %v398_v0, 1 }
  0x53   : > { %v351_v9 = vadd.f32 %v350_v1, %v349_v57  ;;  %v358_v10 = vadd.f32 %v357_v2, %v356_v58  ;;  %v365_v11 = vadd.f32 %v364_v3, %v363_v59  ;;  %v372_v12 = vadd.f32 %v371_v4, %v370_v60 }
  0x54   : > { %v379_v13 = vadd.f32 %v378_v5, %v377_v61  ;;  %v386_v14 = vadd.f32 %v385_v6, %v384_v62  ;;  %vm415_vm3 = vcmask 1044484   ;;  %v393_v16 = vadd.f32 %v392_v7, %v391_v63 }
  0x55   : > { %v410_v15 = vsel %vm409_vm0, %v358_v10, %v351_v9  ;;  %vm417_vm4 = vcmask 1045509   ;;  %v400_v18 = vadd.f32 %v399_v8, %v398_v0  ;;  %vm419_vm5 = vcmask 1046534  }
  0x56   : > { %v412_v17 = vsel %vm411_vm1, %v365_v11, %v410_v15  ;;  %vm421_vm6 = vcmask 1047559  }
  0x57   : > { %v414_v19 = vsel %vm413_vm2, %v372_v12, %v412_v17 }
  0x58   : > { %v416_v20 = vsel %vm415_vm3, %v379_v13, %v414_v19 }
  0x59   : > { %v418_v22 = vsel %vm417_vm4, %v386_v14, %v416_v20 }
  0x5a   : > { %v420_v23 = vsel %vm419_vm5, %v393_v16, %v418_v22  ;;  %429 = sbr.rel (%p591_p3) target bundleno = 378 (0x17a), region = 56 }
  0x5b   : > { %v422_v24 = vsel %vm421_vm6, %v400_v18, %v420_v23 }
  0x5c   : > { %v424_v25 = vadd.f32 %v422_v24, %v312_v21 }
  0x5e   : > { %425 = vst [vmem:[#allocation2] sm:$0xff] %v424_v25 }
  0x5f   : > { %v447_v26 = vld [vmem:[#allocation6 + $0x78] sm:$0xff]  ;;  %v446_v27 = vld [vmem:[#allocation6 + $0x70] sm:$0xff]  ;;  %v445_v28 = vld [vmem:[#allocation6 + $0x68] sm:$0xff]  ;;  %v481_v50 = vstv %s480_s4  ;;  %vm483_vm7 = vcmask 7168  }
  0x60   : > { %452 = vmatpush.msra.mxu0 %v447_v26  ;;  %v444_v29 = vld [vmem:[#allocation6 + $0x60] sm:$0xff]  ;;  %v443_v30 = vld [vmem:[#allocation6 + $0x58] sm:$0xff]  ;;  %v442_v31 = vld [vmem:[#allocation6 + $0x50] sm:$0xff] }
  0x61   : > { %v441_v32 = vld [vmem:[#allocation6 + $0x48] sm:$0xff]  ;;  %v440_v33 = vld [vmem:[#allocation6 + $0x40] sm:$0xff]  ;;  %v439_v34 = vld [vmem:[#allocation6 + $0x38] sm:$0xff] }
  0x62   : > { %453 = vmatpush.msra.mxu0 %v446_v27  ;;  %v438_v35 = vld [vmem:[#allocation6 + $0x30] sm:$0xff]  ;;  %v437_v36 = vld [vmem:[#allocation6 + $0x28] sm:$0xff]  ;;  %v436_v37 = vld [vmem:[#allocation6 + $0x20] sm:$0xff] }
  0x63   : > { %v435_v38 = vld [vmem:[#allocation6 + $0x18] sm:$0xff]  ;;  %v434_v39 = vld [vmem:[#allocation6 + $0x10] sm:$0xff]  ;;  %v433_v41 = vld [vmem:[#allocation6 + $0x8] sm:$0xff] }
  0x64   : > { %454 = vmatpush.msra.mxu0 %v445_v28  ;;  %v432_v42 = vld [vmem:[#allocation6] sm:$0xff]  ;;  %v727_v44 = vld [vmem:[%s1037_s2] ss:$0 sm:$0xff] }
  0x65   : > { %v430_v40 = vld [vmem:[#allocation2] sm:$0xff] }
  0x66   : > { %455 = vmatpush.msra.mxu0 %v444_v29  ;;  %v431_v43 = vmul.f32 0.03125, %v430_v40  ;;  %v728_v47 = vld [vmem:[%s1038_s3] ss:$0 sm:$0xff] }
  0x68   : > { %456 = vmatpush.msra.mxu0 %v443_v30 }
  0x6a   : > { %457 = vmatpush.msra.mxu0 %v442_v31 }
  0x6c   : > { %458 = vmatpush.msra.mxu0 %v441_v32 }
  0x6e   : > { %459 = vmatpush.msra.mxu0 %v440_v33 }
  0x70   : > { %460 = vmatpush.msra.mxu0 %v439_v34 }
  0x72   : > { %461 = vmatpush.msra.mxu0 %v438_v35 }
  0x74   : > { %462 = vmatpush.msra.mxu0 %v437_v36 }
  0x76   : > { %463 = vmatpush.msra.mxu0 %v436_v37 }
  0x78   : > { %464 = vmatpush.msra.mxu0 %v435_v38 }
  0x7a   : > { %465 = vmatpush.msra.mxu0 %v434_v39 }
  0x7c   : > { %466 = vmatpush.msra.mxu0 %v433_v41 }
  0x7e   : > { %467 = vmatpush.msra.mxu0 %v432_v42 }
  0x7f   : > { %468 = vmatmul.f32.vlgmr.msra.gmra.mxu0 %v431_v43 }
  0xfc   : > { %v469_v45 = vpop.f32.mrf.mxu0 }
  0xfd   : > { %v470_v46 = vadd.f32 %v727_v44, %v469_v45 }
  0xff   : > { %v472_v48 = vmax.f32 %v470_v46, 0.0 }
 0x101   : > { %v477_v49 = vmul.f32 %v728_v47, %v472_v48 }
 0x103   : > { %478 = vadd.xlane.f32.xlu0 %v477_v49 }
 0x176   : > { %v479_v51 = vpop.xlane.xlu0 %478 }
 0x177   : > { %v482_v52 = vadd.f32 %v481_v50, %v479_v51 }
 0x179   : > { %484 = vst.msk [vmem:[%s998_s12] sm:$0xff] %vm483_vm7, %v482_v52 }
 0x17a PF: > { %s20_s27 = sadd.s32 1, %s829_s27   ;;  %s1051_s15 = sld [smem:[#allocation13_spill]] }
 0x17b   : > { %p17_p4 = scmp.ge.s32.totalorder %s20_s27, 6   ;;  %s1052_s6 = sld [smem:[#allocation14_spill]] }
 0x17c   : > { %s1053_s20 = smov %s805_s21  ;;  %s1054_s21 = smov %s809_s22 }
 0x17d   : > { %s1055_s22 = smov %s953_s16  ;;  %s1056_s23 = smov %s821_s25 }
 0x17e   : > { %s1057_s24 = smov %s825_s26  ;;  %19 = sbr.rel (!%p17_p4) target bundleno = 9 (0x9), region = 97 }
 0x180   : > { %s1058_s25 = smov %s1051_s15 }
 0x181   : > { %s1059_s26 = smov %s1052_s6 }
 0x183   :  { %504 = vsyncpa [#allocation5], 1 }
 0x184   :  { %506 = vsyncpa [#allocation5 + $0x1], 1 }
 0x185   :  { %507 = vsyncpa [#allocation7], 1 }

</bundles_post_ra>
